<compile_context>
chip_gen: v6e
topology: v6e:2x2x1
jax: 0.10.0
libtpu: 0.0.40
codegen_flags: <defaults>
</compile_context>

<pallas_src>
import jax
import jax.numpy as jnp
import numpy as np
from jax import lax
from jax.experimental import pallas as pl
from jax.experimental.pallas import tpu as pltpu

MITR = 300          # max Picard iterations (matches ImplicitFunction.inn_pred)
TOL = 3e-6          # convergence tolerance (matches ImplicitFunction.inn_pred)
INF_BALL_V = 0.95   # radius of the inf-norm ball (matches ImplicitFunctionInf)
K_UNROLL = 10       # Picard steps per convergence check (300 % 10 == 0)


def implicit_kernel(at_ref, bt_ref, ct_ref, dt_ref, u_ref, y_ref, x_ref, bu_ref):
    """One batch-block, everything VMEM-resident, transposed ("batch-major") layout.

    at_ref: (n, n) = A^T     bt_ref: (p, n) = B^T
    ct_ref: (n, q) = C^T     dt_ref: (p, q) = D^T
    u_ref : (bm, p) = U^T (batch-major input)     y_ref: (bm, q)
    x_ref : (bm, n) f32 scratch (X^T)             bu_ref: (bm, n) f32 scratch ((B U)^T)
    """
    U = u_ref[...]                                                      # (bm, p)

    # Loop-invariant (B @ U)^T, computed once.
    BUt = jnp.dot(U, bt_ref[...], preferred_element_type=jnp.float32)  # (bm, n)
    bu_ref[...] = BUt

    # Picard iteration 1: X0 = 0  =>  A @ X0 = 0  =>  X1 = relu(B U).
    # err1 = max|X1 - X0| = max(X1) since X1 >= 0.
    X1 = jnp.maximum(BUt, 0.0)
    x_ref[...] = X1
    err0 = jnp.max(X1)

    def cond(carry):
        it, err = carry
        return jnp.logical_and(it < MITR, err >= TOL)

    def body(carry):
        it, _ = carry
        At = at_ref[...]
        BU = bu_ref[...]
        Xt = x_ref[...]
        X_prev = Xt
        # K_UNROLL statically unrolled Picard steps, no per-step convergence
        # check on the serial chain.
        for _ in range(K_UNROLL):
            X_prev = Xt
            Xt = jnp.maximum(
                jnp.dot(Xt, At, preferred_element_type=jnp.float32) + BU, 0.0)
        x_ref[...] = Xt
        err = jnp.max(jnp.abs(Xt - X_prev))          # one XLU reduce per chunk
        return it + K_UNROLL, err

    # Scalar-only carry; X^T lives in VMEM scratch.  Worst (never-converged)
    # case runs 301 steps vs. PyTorch's 300 -- difference is O(0.95^300).
    lax.while_loop(cond, body, (jnp.int32(1), err0))

    Xt = x_ref[...]
    Y = (jnp.dot(Xt, ct_ref[...], preferred_element_type=jnp.float32)
         + jnp.dot(U, dt_ref[...], preferred_element_type=jnp.float32))  # (bm, q)
    y_ref[...] = Y.astype(y_ref.dtype)


def project_a_inf(A, v=INF_BALL_V):
    """Row-wise projection of A onto the L-inf matrix-norm ball ||A||_inf <= v.

    Mirrors ImplicitFunctionInf.forward's numpy preprocessing (parameter prep),
    done as plain-JAX glue outside the kernel.
    """
    abs_a = jnp.abs(A)
    norms = jnp.sum(abs_a, axis=-1, keepdims=True)
    u = jnp.sort(abs_a, axis=-1)[:, ::-1]                       # descending
    css = jnp.cumsum(u, axis=-1)
    k = jnp.arange(1, A.shape[-1] + 1, dtype=A.dtype)
    rho = jnp.sum((u * k > (css - v)).astype(jnp.int32), axis=-1, keepdims=True)
    theta = (jnp.take_along_axis(css, rho - 1, axis=-1) - v) / rho.astype(A.dtype)
    proj = jnp.sign(A) * jnp.maximum(abs_a - theta, 0.0)
    return jnp.where(norms > v, proj, A)


def make_params(n, p, q, key):
    """Deterministic parameter init matching nn.Parameter(torch.randn(...) / n)."""
    k1, k2, k3, k4 = jax.random.split(key, 4)
    return dict(
        A=jax.random.normal(k1, (n, n), jnp.float32) / n,
        B=jax.random.normal(k2, (n, p), jnp.float32) / n,
        C=jax.random.normal(k3, (q, n), jnp.float32) / n,
        D=jax.random.normal(k4, (q, p), jnp.float32) / n,
    )


def _pick_batch_block(m):
    """Batch-block size: whole batch when small, else an 8-multiple divisor."""
    if m <= 256:
        return m
    for bm in (512, 256, 128, 64, 32, 16, 8):
        if m % bm == 0:
            return bm
    return m


@jax.jit
def implicit_model_forward(params, U):
    """ImplicitModel.forward (bias=False, no_D=False, X0=None)."""
    if U.ndim == 3:                                  # U.flatten(1, -1)
        U = U.reshape(U.shape[0], -1)
    U = U.astype(jnp.float32)                        # batch-major == U^T in math layout

    A = project_a_inf(params["A"])                   # ImplicitFunctionInf projection
    At = jnp.transpose(A)
    Bt = jnp.transpose(params["B"])
    Ct = jnp.transpose(params["C"])
    Dt = jnp.transpose(params["D"])

    m, p = U.shape
    n = At.shape[0]
    q = Ct.shape[1]
    assert p == Bt.shape[0], (
        f"Given input size {p} does not match expected input size {Bt.shape[0]}.")

    bm = _pick_batch_block(m)
    grid = (m // bm,)

    expected_iters = 64  # advisory only
    cost = pl.CostEstimate(
        flops=2 * m * n * n * expected_iters + 2 * m * p * n + 2 * m * n * q + 2 * m * p * q,
        transcendentals=0,
        bytes_accessed=4 * (n * n + p * n + n * q + p * q + m * p + m * q),
    )

    y = pl.pallas_call(
        implicit_kernel,
        out_shape=jax.ShapeDtypeStruct((m, q), jnp.float32),
        grid=grid,
        in_specs=[
            pl.BlockSpec((n, n), lambda i: (0, 0)),   # A^T (replicated)
            pl.BlockSpec((p, n), lambda i: (0, 0)),   # B^T (replicated)
            pl.BlockSpec((n, q), lambda i: (0, 0)),   # C^T (replicated)
            pl.BlockSpec((p, q), lambda i: (0, 0)),   # D^T (replicated)
            pl.BlockSpec((bm, p), lambda i: (i, 0)),  # U (batch-blocked)
        ],
        out_specs=pl.BlockSpec((bm, q), lambda i: (i, 0)),
        scratch_shapes=[
            pltpu.VMEM((bm, n), jnp.float32),         # X^T
            pltpu.VMEM((bm, n), jnp.float32),         # (B U)^T
        ],
        compiler_params=pltpu.CompilerParams(
            dimension_semantics=("parallel",)),       # batch blocks are independent
        cost_estimate=cost,
    )(At, Bt, Ct, Dt, U)

    return y                                          # already (batch, q)


def reference_forward(params, U):
    """Pure-JAX reference matching the exact PyTorch semantics (for validation)."""
    if U.ndim == 3:
        U = U.reshape(U.shape[0], -1)
    Ut = jnp.transpose(U).astype(jnp.float32)
    A = project_a_inf(params["A"])
    B, C, D = params["B"], params["C"], params["D"]
    X = jnp.zeros((A.shape[0], Ut.shape[1]), jnp.float32)
    for _ in range(MITR):
        X_new = jnp.maximum(A @ X + B @ Ut, 0.0)
        err = float(jnp.max(jnp.abs(X_new - X)))
        X = X_new
        if err < TOL:
            break
    return jnp.transpose(C @ X + D @ Ut)


if __name__ == "__main__":
    n, p, q = 32, 16, 4       # hidden / input / output features
    batch = 8                 # m

    key = jax.random.PRNGKey(0)
    k_params, k_input = jax.random.split(key)
    params = make_params(n, p, q, k_params)
    U = jax.random.normal(k_input, (batch, p), jnp.float32)

    out = implicit_model_forward(params, U)
    out = jax.block_until_ready(out)
    assert out.shape == (batch, q)

    ref = reference_forward(params, U)
    np.testing.assert_allclose(np.asarray(out), np.asarray(ref), rtol=1e-3, atol=1e-3)

    print("KERNEL_OK")
</pallas_src>

<mosaic_0001>
module attributes {stable_mosaic.version = 11 : i64} {
  func.func @implicit_kernel(%arg0: i32, %arg1: memref<32x32xf32, #tpu.memory_space<vmem>>, %arg2: memref<16x32xf32, #tpu.memory_space<vmem>>, %arg3: memref<32x4xf32, #tpu.memory_space<vmem>>, %arg4: memref<16x4xf32, #tpu.memory_space<vmem>>, %arg5: memref<8x16xf32, #tpu.memory_space<vmem>>, %arg6: memref<8x4xf32, #tpu.memory_space<vmem>>, %arg7: memref<8x32xf32, #tpu.memory_space<vmem>>, %arg8: memref<8x32xf32, #tpu.memory_space<vmem>>) attributes {dimension_semantics = [#tpu.dimension_semantics<parallel>], iteration_bounds = array<i64: 1>, scalar_prefetch = 0 : i64, scratch_operands = 2 : i64, tpu.core_type = #tpu.core_type<tc>, window_params = [{pipeline_mode = #tpu.pipeline_mode<synchronous>, transform_indices = @transform_0, window_bounds = array<i64: 32, 32>}, {pipeline_mode = #tpu.pipeline_mode<synchronous>, transform_indices = @transform_1, window_bounds = array<i64: 16, 32>}, {pipeline_mode = #tpu.pipeline_mode<synchronous>, transform_indices = @transform_2, window_bounds = array<i64: 32, 4>}, {pipeline_mode = #tpu.pipeline_mode<synchronous>, transform_indices = @transform_3, window_bounds = array<i64: 16, 4>}, {transform_indices = @transform_4, window_bounds = array<i64: 8, 16>}, {transform_indices = @transform_5, window_bounds = array<i64: 8, 4>}]} {
    %c0 = arith.constant 0 : index
    %c0_0 = arith.constant 0 : index
    %0 = vector.load %arg5[%c0, %c0_0] : memref<8x16xf32, #tpu.memory_space<vmem>>, vector<8x16xf32>
    %c0_1 = arith.constant 0 : index
    %c0_2 = arith.constant 0 : index
    %1 = vector.load %arg2[%c0_1, %c0_2] : memref<16x32xf32, #tpu.memory_space<vmem>>, vector<16x32xf32>
    %cst = arith.constant dense<0.000000e+00> : vector<8x32xf32>
    %2 = tpu.matmul %0, %1, %cst {dimension_numbers = #tpu.dot_dimension_numbers<[1], [0], [0], [1], [0, 0, 1, 1], [], []>} : vector<8x16xf32>, vector<16x32xf32>, vector<8x32xf32> -> vector<8x32xf32>
    %c0_3 = arith.constant 0 : index
    %c0_4 = arith.constant 0 : index
    %3 = vector.load %arg8[%c0_3, %c0_4] : memref<8x32xf32, #tpu.memory_space<vmem>>, vector<8x32xf32>
    tpu.vector_store %arg8[%c0_3, %c0_4], %2 {strides = array<i32>} : memref<8x32xf32, #tpu.memory_space<vmem>>, vector<8x32xf32>,
    %cst_5 = arith.constant 0.000000e+00 : f32
    %4 = vector.broadcast %cst_5 : f32 to vector<8x32xf32>
    %5 = arith.maximumf %2, %4 : vector<8x32xf32>
    %c0_6 = arith.constant 0 : index
    %c0_7 = arith.constant 0 : index
    %6 = vector.load %arg7[%c0_6, %c0_7] : memref<8x32xf32, #tpu.memory_space<vmem>>, vector<8x32xf32>
    tpu.vector_store %arg7[%c0_6, %c0_7], %5 {strides = array<i32>} : memref<8x32xf32, #tpu.memory_space<vmem>>, vector<8x32xf32>,
    %7 = vector.shape_cast %5 : vector<8x32xf32> to vector<1x8x32xf32>
    %cst_8 = arith.constant dense<0xFF800000> : vector<1xf32>
    %8 = vector.multi_reduction <maximumf>, %7, %cst_8 [1, 2] : vector<1x8x32xf32> to vector<1xf32>
    %9 = vector.shape_cast %8 : vector<1xf32> to vector<1x1x1xf32>
    %10 = vector.extract %9[0, 0, 0] : f32 from vector<1x1x1xf32>
    %c1_i32 = arith.constant 1 : i32
    %11:2 = scf.while (%arg9 = %c1_i32, %arg10 = %10) : (i32, f32) -> (i32, f32) {
      %c300_i32 = arith.constant 300 : i32
      %19 = arith.cmpi slt, %arg9, %c300_i32 : i32
      %cst_19 = arith.constant 3.000000e-06 : f32
      %20 = arith.cmpf oge, %arg10, %cst_19 : f32
      %21 = arith.andi %19, %20 : i1
      scf.condition(%21) %arg9, %arg10 : i32, f32
    } do {
    ^bb0(%arg9: i32, %arg10: f32):
      %c0_19 = arith.constant 0 : index
      %c0_20 = arith.constant 0 : index
      %19 = vector.load %arg1[%c0_19, %c0_20] : memref<32x32xf32, #tpu.memory_space<vmem>>, vector<32x32xf32>
      %c0_21 = arith.constant 0 : index
      %c0_22 = arith.constant 0 : index
      %20 = vector.load %arg8[%c0_21, %c0_22] : memref<8x32xf32, #tpu.memory_space<vmem>>, vector<8x32xf32>
      %c0_23 = arith.constant 0 : index
      %c0_24 = arith.constant 0 : index
      %21 = vector.load %arg7[%c0_23, %c0_24] : memref<8x32xf32, #tpu.memory_space<vmem>>, vector<8x32xf32>
      %cst_25 = arith.constant dense<0.000000e+00> : vector<8x32xf32>
      %22 = tpu.matmul %21, %19, %cst_25 {dimension_numbers = #tpu.dot_dimension_numbers<[1], [0], [0], [1], [0, 0, 1, 1], [], []>} : vector<8x32xf32>, vector<32x32xf32>, vector<8x32xf32> -> vector<8x32xf32>
      %23 = arith.addf %22, %20 : vector<8x32xf32>
      %cst_26 = arith.constant 0.000000e+00 : f32
      %24 = vector.broadcast %cst_26 : f32 to vector<8x32xf32>
      %25 = arith.maximumf %23, %24 : vector<8x32xf32>
      %cst_27 = arith.constant dense<0.000000e+00> : vector<8x32xf32>
      %26 = tpu.matmul %25, %19, %cst_27 {dimension_numbers = #tpu.dot_dimension_numbers<[1], [0], [0], [1], [0, 0, 1, 1], [], []>} : vector<8x32xf32>, vector<32x32xf32>, vector<8x32xf32> -> vector<8x32xf32>
      %27 = arith.addf %26, %20 : vector<8x32xf32>
      %cst_28 = arith.constant 0.000000e+00 : f32
      %28 = vector.broadcast %cst_28 : f32 to vector<8x32xf32>
      %29 = arith.maximumf %27, %28 : vector<8x32xf32>
      %cst_29 = arith.constant dense<0.000000e+00> : vector<8x32xf32>
      %30 = tpu.matmul %29, %19, %cst_29 {dimension_numbers = #tpu.dot_dimension_numbers<[1], [0], [0], [1], [0, 0, 1, 1], [], []>} : vector<8x32xf32>, vector<32x32xf32>, vector<8x32xf32> -> vector<8x32xf32>
      %31 = arith.addf %30, %20 : vector<8x32xf32>
      %cst_30 = arith.constant 0.000000e+00 : f32
      %32 = vector.broadcast %cst_30 : f32 to vector<8x32xf32>
      %33 = arith.maximumf %31, %32 : vector<8x32xf32>
      %cst_31 = arith.constant dense<0.000000e+00> : vector<8x32xf32>
      %34 = tpu.matmul %33, %19, %cst_31 {dimension_numbers = #tpu.dot_dimension_numbers<[1], [0], [0], [1], [0, 0, 1, 1], [], []>} : vector<8x32xf32>, vector<32x32xf32>, vector<8x32xf32> -> vector<8x32xf32>
      %35 = arith.addf %34, %20 : vector<8x32xf32>
      %cst_32 = arith.constant 0.000000e+00 : f32
      %36 = vector.broadcast %cst_32 : f32 to vector<8x32xf32>
      %37 = arith.maximumf %35, %36 : vector<8x32xf32>
      %cst_33 = arith.constant dense<0.000000e+00> : vector<8x32xf32>
      %38 = tpu.matmul %37, %19, %cst_33 {dimension_numbers = #tpu.dot_dimension_numbers<[1], [0], [0], [1], [0, 0, 1, 1], [], []>} : vector<8x32xf32>, vector<32x32xf32>, vector<8x32xf32> -> vector<8x32xf32>
      %39 = arith.addf %38, %20 : vector<8x32xf32>
      %cst_34 = arith.constant 0.000000e+00 : f32
      %40 = vector.broadcast %cst_34 : f32 to vector<8x32xf32>
      %41 = arith.maximumf %39, %40 : vector<8x32xf32>
      %cst_35 = arith.constant dense<0.000000e+00> : vector<8x32xf32>
      %42 = tpu.matmul %41, %19, %cst_35 {dimension_numbers = #tpu.dot_dimension_numbers<[1], [0], [0], [1], [0, 0, 1, 1], [], []>} : vector<8x32xf32>, vector<32x32xf32>, vector<8x32xf32> -> vector<8x32xf32>
      %43 = arith.addf %42, %20 : vector<8x32xf32>
      %cst_36 = arith.constant 0.000000e+00 : f32
      %44 = vector.broadcast %cst_36 : f32 to vector<8x32xf32>
      %45 = arith.maximumf %43, %44 : vector<8x32xf32>
      %cst_37 = arith.constant dense<0.000000e+00> : vector<8x32xf32>
      %46 = tpu.matmul %45, %19, %cst_37 {dimension_numbers = #tpu.dot_dimension_numbers<[1], [0], [0], [1], [0, 0, 1, 1], [], []>} : vector<8x32xf32>, vector<32x32xf32>, vector<8x32xf32> -> vector<8x32xf32>
      %47 = arith.addf %46, %20 : vector<8x32xf32>
      %cst_38 = arith.constant 0.000000e+00 : f32
      %48 = vector.broadcast %cst_38 : f32 to vector<8x32xf32>
      %49 = arith.maximumf %47, %48 : vector<8x32xf32>
      %cst_39 = arith.constant dense<0.000000e+00> : vector<8x32xf32>
      %50 = tpu.matmul %49, %19, %cst_39 {dimension_numbers = #tpu.dot_dimension_numbers<[1], [0], [0], [1], [0, 0, 1, 1], [], []>} : vector<8x32xf32>, vector<32x32xf32>, vector<8x32xf32> -> vector<8x32xf32>
      %51 = arith.addf %50, %20 : vector<8x32xf32>
      %cst_40 = arith.constant 0.000000e+00 : f32
      %52 = vector.broadcast %cst_40 : f32 to vector<8x32xf32>
      %53 = arith.maximumf %51, %52 : vector<8x32xf32>
      %cst_41 = arith.constant dense<0.000000e+00> : vector<8x32xf32>
      %54 = tpu.matmul %53, %19, %cst_41 {dimension_numbers = #tpu.dot_dimension_numbers<[1], [0], [0], [1], [0, 0, 1, 1], [], []>} : vector<8x32xf32>, vector<32x32xf32>, vector<8x32xf32> -> vector<8x32xf32>
      %55 = arith.addf %54, %20 : vector<8x32xf32>
      %cst_42 = arith.constant 0.000000e+00 : f32
      %56 = vector.broadcast %cst_42 : f32 to vector<8x32xf32>
      %57 = arith.maximumf %55, %56 : vector<8x32xf32>
      %cst_43 = arith.constant dense<0.000000e+00> : vector<8x32xf32>
      %58 = tpu.matmul %57, %19, %cst_43 {dimension_numbers = #tpu.dot_dimension_numbers<[1], [0], [0], [1], [0, 0, 1, 1], [], []>} : vector<8x32xf32>, vector<32x32xf32>, vector<8x32xf32> -> vector<8x32xf32>
      %59 = arith.addf %58, %20 : vector<8x32xf32>
      %cst_44 = arith.constant 0.000000e+00 : f32
      %60 = vector.broadcast %cst_44 : f32 to vector<8x32xf32>
      %61 = arith.maximumf %59, %60 : vector<8x32xf32>
      %c0_45 = arith.constant 0 : index
      %c0_46 = arith.constant 0 : index
      %62 = vector.load %arg7[%c0_45, %c0_46] : memref<8x32xf32, #tpu.memory_space<vmem>>, vector<8x32xf32>
      tpu.vector_store %arg7[%c0_45, %c0_46], %61 {strides = array<i32>} : memref<8x32xf32, #tpu.memory_space<vmem>>, vector<8x32xf32>,
      %63 = arith.subf %61, %57 : vector<8x32xf32>
      %64 = math.absf %63 : vector<8x32xf32>
      %65 = vector.shape_cast %64 : vector<8x32xf32> to vector<1x8x32xf32>
      %cst_47 = arith.constant dense<0xFF800000> : vector<1xf32>
      %66 = vector.multi_reduction <maximumf>, %65, %cst_47 [1, 2] : vector<1x8x32xf32> to vector<1xf32>
      %67 = vector.shape_cast %66 : vector<1xf32> to vector<1x1x1xf32>
      %68 = vector.extract %67[0, 0, 0] : f32 from vector<1x1x1xf32>
      %c10_i32 = arith.constant 10 : i32
      %69 = arith.addi %arg9, %c10_i32 : i32
      scf.yield %69, %68 : i32, f32
    }
    %c0_9 = arith.constant 0 : index
    %c0_10 = arith.constant 0 : index
    %12 = vector.load %arg7[%c0_9, %c0_10] : memref<8x32xf32, #tpu.memory_space<vmem>>, vector<8x32xf32>
    %c0_11 = arith.constant 0 : index
    %c0_12 = arith.constant 0 : index
    %13 = vector.load %arg3[%c0_11, %c0_12] : memref<32x4xf32, #tpu.memory_space<vmem>>, vector<32x4xf32>
    %cst_13 = arith.constant dense<0.000000e+00> : vector<8x4xf32>
    %14 = tpu.matmul %12, %13, %cst_13 {dimension_numbers = #tpu.dot_dimension_numbers<[1], [0], [0], [1], [0, 0, 1, 1], [], []>} : vector<8x32xf32>, vector<32x4xf32>, vector<8x4xf32> -> vector<8x4xf32>
    %c0_14 = arith.constant 0 : index
    %c0_15 = arith.constant 0 : index
    %15 = vector.load %arg4[%c0_14, %c0_15] : memref<16x4xf32, #tpu.memory_space<vmem>>, vector<16x4xf32>
    %cst_16 = arith.constant dense<0.000000e+00> : vector<8x4xf32>
    %16 = tpu.matmul %0, %15, %cst_16 {dimension_numbers = #tpu.dot_dimension_numbers<[1], [0], [0], [1], [0, 0, 1, 1], [], []>} : vector<8x16xf32>, vector<16x4xf32>, vector<8x4xf32> -> vector<8x4xf32>
    %17 = arith.addf %14, %16 : vector<8x4xf32>
    %c0_17 = arith.constant 0 : index
    %c0_18 = arith.constant 0 : index
    %18 = vector.load %arg6[%c0_17, %c0_18] : memref<8x4xf32, #tpu.memory_space<vmem>>, vector<8x4xf32>
    tpu.vector_store %arg6[%c0_17, %c0_18], %17 {strides = array<i32>} : memref<8x4xf32, #tpu.memory_space<vmem>>, vector<8x4xf32>,
    return
  }
  func.func @transform_0(%arg0: i32) -> (i32, i32) {
    %c0_i32 = arith.constant 0 : i32
    %c0_i32_0 = arith.constant 0 : i32
    %c0_i32_1 = arith.constant 0 : i32
    return %c0_i32, %c0_i32_0 : i32, i32
  }
  func.func @transform_1(%arg0: i32) -> (i32, i32) {
    %c0_i32 = arith.constant 0 : i32
    %c0_i32_0 = arith.constant 0 : i32
    %c0_i32_1 = arith.constant 0 : i32
    return %c0_i32, %c0_i32_0 : i32, i32
  }
  func.func @transform_2(%arg0: i32) -> (i32, i32) {
    %c0_i32 = arith.constant 0 : i32
    %c0_i32_0 = arith.constant 0 : i32
    %c0_i32_1 = arith.constant 0 : i32
    return %c0_i32, %c0_i32_0 : i32, i32
  }
  func.func @transform_3(%arg0: i32) -> (i32, i32) {
    %c0_i32 = arith.constant 0 : i32
    %c0_i32_0 = arith.constant 0 : i32
    %c0_i32_1 = arith.constant 0 : i32
    return %c0_i32, %c0_i32_0 : i32, i32
  }
  func.func @transform_4(%arg0: i32) -> (i32, i32) {
    %c0_i32 = arith.constant 0 : i32
    %c0_i32_0 = arith.constant 0 : i32
    return %arg0, %c0_i32 : i32, i32
  }
  func.func @transform_5(%arg0: i32) -> (i32, i32) {
    %c0_i32 = arith.constant 0 : i32
    %c0_i32_0 = arith.constant 0 : i32
    return %arg0, %c0_i32 : i32, i32
  }
}

</mosaic_0001>

<bundles_post_ra>
// kernel: implicit_model_forward.1
= control target key start
LH: loop header
LB: loop body
LE: loop exit
PB: predicated region body
PF: predicated region fallthrough
CT: control target
= control target key end

     0   :  { %v1278_v0 = vmov 0.0   ;;  %vm1279_vm0 = vmmov 0   ;;  %vm23_vm1 = vcmask 130048   ;;  %vm97_vm2 = vcmask 261120   ;;  %s1518_s0 = inlined_call_operand.vmem [shape: f32[32,32], index: 0, kind: input, shape index: {}]   ;;  %s1519_s2 = inlined_call_operand.vmem [shape: f32[32,4], index: 2, kind: input, shape index: {}]   ;;  %s1520_s3 = inlined_call_operand.vmem [shape: f32[16,4], index: 3, kind: input, shape index: {}]   ;;  %s1521_s5 = inlined_call_operand.vmem [shape: f32[8,4], index: 5, kind: output, shape index: {}]   ;;  %s1522_s1 = inlined_call_operand.vmem [shape: f32[16,32], index: 1, kind: input, shape index: {}]   ;;  %s1523_s4 = inlined_call_operand.vmem [shape: f32[8,16], index: 4, kind: input, shape index: {}]  }
   0x1   :  { %1119 = vmatprep.subr.mxu0 %v1278_v0  ;;  %v22_v1 = vld [vmem:[%s1522_s1 + $0x8] sm:$0xff]  ;;  %v21_v2 = vld [vmem:[%s1522_s1] sm:$0xff]  ;;  %1123 = vmatprep.mubr.msk.f32.mxu0 %vm1279_vm0, %v1278_v0 }
   0x2   :  { %1120 = vmatpush3.msra.mxu0 %v22_v1  ;;  %v1324_v3 = vld [vmem:[%s1523_s4] sm:$0xff] }
   0x3   :  { %1121 = vmatprep.subr.mxu0 %v1278_v0 }
   0x4   :  { %1122 = vmatpush3.msra.mxu0 %v21_v2 }
   0x5   :  { %1124 = vmatmul.mubr.msk.f32.vlgmr.msra.gmra.mxu0 %vm23_vm1, %v1324_v3 }
  0xc5   :  { %v93_v4 = vpop.f32.mrf.mxu0 }
  0xc6   :  { %98 = vst.msk [vmem:[#allocation3] sm:$0xff] %vm97_vm2, %v93_v4  ;;  %v99_v5 = vmax.f32 %v93_v4, 0.0 }
  0xc7   :  { %v1125_v6 = vpop.f32.mrf.mxu0 }
  0xc8   :  { %100 = vst.msk [vmem:[#allocation2] sm:$0xff] %vm97_vm2, %v99_v5  ;;  %v101_v7 = vsel %vm97_vm2, %v99_v5, -inf }
  0xc9   :  { %102 = vmax.xlane.f32.xlu0 %v101_v7 }
 0x152   :  { %v103_v8 = vpop.xlane.xlu0 %102 }
 0x153   :  { %v104_v9 = vrot.slane %v103_v8, 4 }
 0x155   :  { %v105_v10 = vmax.f32 %v103_v8, %v104_v9 }
 0x157   :  { %v106_v11 = vrot.slane %v105_v10, 2 }
 0x159   :  { %v107_v12 = vmax.f32 %v105_v10, %v106_v11 }
 0x15b   :  { %v108_v13 = vrot.slane %v107_v12, 1 }
 0x15d   :  { %v109_v14 = vmax.f32 %v107_v12, %v108_v13 }
 0x15f   :  { %1254 = vpush %v109_v14 }
 0x190   :  { %s1255_s1 = spop %1254 }
 0x191   :  { %p1039_p0 = scmp.ge.f32.partialorder %s1255_s1, 3e-06 }
 0x192   :  { %s1332_s4 = smov (%p1039_p0), 1  }
 0x193   :  { %1041 = sbr.rel (!%p1039_p0) target bundleno = 2601 (0xa29), region = 41 }
 0x198 LB: > { %v1340_v15 = vld [vmem:[%s1518_s0 + $0x18] sm:$0xff]  ;;  %v1280_v16 = vmov 0.0   ;;  %v1346_v17 = vld [vmem:[%s1518_s0 + $0x10] sm:$0xff]  ;;  %vm1281_vm3 = vmmov 0   ;;  %v1356_v18 = vld [vmem:[%s1518_s0 + $0x8] sm:$0xff]  ;;  %s879_s4 = sadd.s32 10, %s1276_s4   ;;  %s1276_s4 = sphi %s1332_s4, %s879_s4  }
 0x199   : > { %1126 = vmatprep.subr.mxu0 %v1280_v16  ;;  %1134 = vmatprep.mubr.msk.f32.mxu0 %vm1281_vm3, %v1280_v16  ;;  %v1365_v19 = vld [vmem:[%s1518_s0] sm:$0xff]  ;;  %v1390_v21 = vld [vmem:[#allocation3] sm:$0xff]  ;;  %p114_p1 = scmp.lt.s32.totalorder %s879_s4, 300 }
 0x19a   : > { %1127 = vmatpush3.msra.mxu0 %v1340_v15  ;;  %1137 = vmatprep.subr.mxu1 %v1280_v16  ;;  %v125_v20 = vld [vmem:[#allocation2] sm:$0xff] }
 0x19b   : > { %1128 = vmatprep.subr.mxu0 %v1280_v16  ;;  %1138 = vmatpush3.msra.mxu1 %v1340_v15 }
 0x19c   : > { %1129 = vmatpush3.msra.mxu0 %v1346_v17  ;;  %1139 = vmatprep.subr.mxu1 %v1280_v16 }
 0x19d   : > { %1130 = vmatprep.subr.mxu0 %v1280_v16  ;;  %1140 = vmatpush3.msra.mxu1 %v1346_v17 }
 0x19e   : > { %1131 = vmatpush3.msra.mxu0 %v1356_v18  ;;  %1141 = vmatprep.subr.mxu1 %v1280_v16 }
 0x19f   : > { %1132 = vmatprep.subr.mxu0 %v1280_v16  ;;  %1142 = vmatpush3.msra.mxu1 %v1356_v18 }
 0x1a0   : > { %1133 = vmatpush3.msra.mxu0 %v1365_v19  ;;  %1143 = vmatprep.subr.mxu1 %v1280_v16 }
 0x1a1   : > { %1135 = vmatmul.mubr.msk.f32.vlgmr.msra.gmra.mxu0 %vm97_vm2, %v125_v20  ;;  %1144 = vmatpush3.msra.mxu1 %v1365_v19 }
 0x1a2   : > { %1145 = vmatprep.mubr.msk.f32.mxu1 %vm1281_vm3, %v1280_v16  ;;  %1148 = vmatprep.subr.mxu0 %v1280_v16 }
 0x1a3   : > { %1149 = vmatpush3.msra.mxu0 %v1340_v15  ;;  %1156 = vmatprep.mubr.msk.f32.mxu0 %vm1281_vm3, %v1280_v16 }
 0x1a4   : > { %1150 = vmatprep.subr.mxu0 %v1280_v16  ;;  %1159 = vmatprep.subr.mxu1 %v1280_v16 }
 0x1a5   : > { %1151 = vmatpush3.msra.mxu0 %v1346_v17 }
 0x1a6   : > { %1152 = vmatprep.subr.mxu0 %v1280_v16 }
 0x1a7   : > { %1153 = vmatpush3.msra.mxu0 %v1356_v18 }
 0x1a8   : > { %1154 = vmatprep.subr.mxu0 %v1280_v16 }
 0x1a9   : > { %1155 = vmatpush3.msra.mxu0 %v1365_v19 }
 0x1aa   : > { %1170 = vmatprep.subr.mxu0 %v1280_v16 }
 0x261   : > { %v195_v22 = vpop.f32.mrf.mxu0 }
 0x262   : > { %v196_v23 = vadd.f32 %v195_v22, %v1390_v21 }
 0x263   : > { %v1136_v24 = vpop.f32.mrf.mxu0 }
 0x264   : > { %v199_v25 = vmax.f32 %v196_v23, 0.0 }
 0x266   : > { %1146 = vmatmul.mubr.msk.f32.vlgmr.msra.gmra.mxu1 %vm97_vm2, %v199_v25 }
 0x267   : > { %1160 = vmatpush3.msra.mxu1 %v1340_v15  ;;  %1167 = vmatprep.mubr.msk.f32.mxu1 %vm1281_vm3, %v1280_v16 }
 0x268   : > { %1161 = vmatprep.subr.mxu1 %v1280_v16 }
 0x269   : > { %1162 = vmatpush3.msra.mxu1 %v1346_v17 }
 0x26a   : > { %1163 = vmatprep.subr.mxu1 %v1280_v16 }
 0x26b   : > { %1164 = vmatpush3.msra.mxu1 %v1356_v18 }
 0x26c   : > { %1165 = vmatprep.subr.mxu1 %v1280_v16 }
 0x26d   : > { %1166 = vmatpush3.msra.mxu1 %v1365_v19 }
 0x26e   : > { %1181 = vmatprep.subr.mxu1 %v1280_v16 }
 0x326   : > { %v269_v26 = vpop.f32.mrf.mxu1 }
 0x327   : > { %v270_v27 = vadd.f32 %v269_v26, %v1390_v21 }
 0x328   : > { %v1147_v28 = vpop.f32.mrf.mxu1 }
 0x329   : > { %v273_v29 = vmax.f32 %v270_v27, 0.0 }
 0x32b   : > { %1157 = vmatmul.mubr.msk.f32.vlgmr.msra.gmra.mxu0 %vm97_vm2, %v273_v29 }
 0x32c   : > { %1171 = vmatpush3.msra.mxu0 %v1340_v15  ;;  %1178 = vmatprep.mubr.msk.f32.mxu0 %vm1281_vm3, %v1280_v16 }
 0x32d   : > { %1172 = vmatprep.subr.mxu0 %v1280_v16 }
 0x32e   : > { %1173 = vmatpush3.msra.mxu0 %v1346_v17 }
 0x32f   : > { %1174 = vmatprep.subr.mxu0 %v1280_v16 }
 0x330   : > { %1175 = vmatpush3.msra.mxu0 %v1356_v18 }
 0x331   : > { %1176 = vmatprep.subr.mxu0 %v1280_v16 }
 0x332   : > { %1177 = vmatpush3.msra.mxu0 %v1365_v19 }
 0x333   : > { %1192 = vmatprep.subr.mxu0 %v1280_v16 }
 0x3eb   : > { %v343_v30 = vpop.f32.mrf.mxu0 }
 0x3ec   : > { %v344_v31 = vadd.f32 %v343_v30, %v1390_v21 }
 0x3ed   : > { %v1158_v32 = vpop.f32.mrf.mxu0 }
 0x3ee   : > { %v347_v33 = vmax.f32 %v344_v31, 0.0 }
 0x3f0   : > { %1168 = vmatmul.mubr.msk.f32.vlgmr.msra.gmra.mxu1 %vm97_vm2, %v347_v33 }
 0x3f1   : > { %1182 = vmatpush3.msra.mxu1 %v1340_v15  ;;  %1189 = vmatprep.mubr.msk.f32.mxu1 %vm1281_vm3, %v1280_v16 }
 0x3f2   : > { %1183 = vmatprep.subr.mxu1 %v1280_v16 }
 0x3f3   : > { %1184 = vmatpush3.msra.mxu1 %v1346_v17 }
 0x3f4   : > { %1185 = vmatprep.subr.mxu1 %v1280_v16 }
 0x3f5   : > { %1186 = vmatpush3.msra.mxu1 %v1356_v18 }
 0x3f6   : > { %1187 = vmatprep.subr.mxu1 %v1280_v16 }
 0x3f7   : > { %1188 = vmatpush3.msra.mxu1 %v1365_v19 }
 0x3f8   : > { %1203 = vmatprep.subr.mxu1 %v1280_v16 }
 0x4b0   : > { %v417_v34 = vpop.f32.mrf.mxu1 }
 0x4b1   : > { %v418_v35 = vadd.f32 %v417_v34, %v1390_v21 }
 0x4b2   : > { %v1169_v36 = vpop.f32.mrf.mxu1 }
 0x4b3   : > { %v421_v37 = vmax.f32 %v418_v35, 0.0 }
 0x4b5   : > { %1179 = vmatmul.mubr.msk.f32.vlgmr.msra.gmra.mxu0 %vm97_vm2, %v421_v37 }
 0x4b6   : > { %1193 = vmatpush3.msra.mxu0 %v1340_v15  ;;  %1200 = vmatprep.mubr.msk.f32.mxu0 %vm1281_vm3, %v1280_v16 }
 0x4b7   : > { %1194 = vmatprep.subr.mxu0 %v1280_v16 }
 0x4b8   : > { %1195 = vmatpush3.msra.mxu0 %v1346_v17 }
 0x4b9   : > { %1196 = vmatprep.subr.mxu0 %v1280_v16 }
 0x4ba   : > { %1197 = vmatpush3.msra.mxu0 %v1356_v18 }
 0x4bb   : > { %1198 = vmatprep.subr.mxu0 %v1280_v16 }
 0x4bc   : > { %1199 = vmatpush3.msra.mxu0 %v1365_v19 }
 0x4bd   : > { %1214 = vmatprep.subr.mxu0 %v1280_v16 }
 0x575   : > { %v491_v38 = vpop.f32.mrf.mxu0 }
 0x576   : > { %v492_v39 = vadd.f32 %v491_v38, %v1390_v21 }
 0x577   : > { %v1180_v40 = vpop.f32.mrf.mxu0 }
 0x578   : > { %v495_v41 = vmax.f32 %v492_v39, 0.0 }
 0x57a   : > { %1190 = vmatmul.mubr.msk.f32.vlgmr.msra.gmra.mxu1 %vm97_vm2, %v495_v41 }
 0x57b   : > { %1204 = vmatpush3.msra.mxu1 %v1340_v15  ;;  %1211 = vmatprep.mubr.msk.f32.mxu1 %vm1281_vm3, %v1280_v16 }
 0x57c   : > { %1205 = vmatprep.subr.mxu1 %v1280_v16 }
 0x57d   : > { %1206 = vmatpush3.msra.mxu1 %v1346_v17 }
 0x57e   : > { %1207 = vmatprep.subr.mxu1 %v1280_v16 }
 0x57f   : > { %1208 = vmatpush3.msra.mxu1 %v1356_v18 }
 0x580   : > { %1209 = vmatprep.subr.mxu1 %v1280_v16 }
 0x581   : > { %1210 = vmatpush3.msra.mxu1 %v1365_v19 }
 0x582   : > { %1225 = vmatprep.subr.mxu1 %v1280_v16 }
 0x63a   : > { %v565_v42 = vpop.f32.mrf.mxu1 }
 0x63b   : > { %v566_v43 = vadd.f32 %v565_v42, %v1390_v21 }
 0x63c   : > { %v1191_v44 = vpop.f32.mrf.mxu1 }
 0x63d   : > { %v569_v45 = vmax.f32 %v566_v43, 0.0 }
 0x63f   : > { %1201 = vmatmul.mubr.msk.f32.vlgmr.msra.gmra.mxu0 %vm97_vm2, %v569_v45 }
 0x640   : > { %1215 = vmatpush3.msra.mxu0 %v1340_v15  ;;  %1222 = vmatprep.mubr.msk.f32.mxu0 %vm1281_vm3, %v1280_v16 }
 0x641   : > { %1216 = vmatprep.subr.mxu0 %v1280_v16 }
 0x642   : > { %1217 = vmatpush3.msra.mxu0 %v1346_v17 }
 0x643   : > { %1218 = vmatprep.subr.mxu0 %v1280_v16 }
 0x644   : > { %1219 = vmatpush3.msra.mxu0 %v1356_v18 }
 0x645   : > { %1220 = vmatprep.subr.mxu0 %v1280_v16 }
 0x646   : > { %1221 = vmatpush3.msra.mxu0 %v1365_v19 }
 0x6ff   : > { %v639_v46 = vpop.f32.mrf.mxu0 }
 0x700   : > { %v640_v47 = vadd.f32 %v639_v46, %v1390_v21 }
 0x701   : > { %v1202_v48 = vpop.f32.mrf.mxu0 }
 0x702   : > { %v643_v49 = vmax.f32 %v640_v47, 0.0 }
 0x704   : > { %1212 = vmatmul.mubr.msk.f32.vlgmr.msra.gmra.mxu1 %vm97_vm2, %v643_v49 }
 0x705   : > { %1226 = vmatpush3.msra.mxu1 %v1340_v15  ;;  %1233 = vmatprep.mubr.msk.f32.mxu1 %vm1281_vm3, %v1280_v16 }
 0x706   : > { %1227 = vmatprep.subr.mxu1 %v1280_v16 }
 0x707   : > { %1228 = vmatpush3.msra.mxu1 %v1346_v17 }
 0x708   : > { %1229 = vmatprep.subr.mxu1 %v1280_v16 }
 0x709   : > { %1230 = vmatpush3.msra.mxu1 %v1356_v18 }
 0x70a   : > { %1231 = vmatprep.subr.mxu1 %v1280_v16 }
 0x70b   : > { %1232 = vmatpush3.msra.mxu1 %v1365_v19 }
 0x7c4   : > { %v713_v50 = vpop.f32.mrf.mxu1 }
 0x7c5   : > { %v714_v51 = vadd.f32 %v713_v50, %v1390_v21 }
 0x7c6   : > { %v1213_v52 = vpop.f32.mrf.mxu1 }
 0x7c7   : > { %v717_v53 = vmax.f32 %v714_v51, 0.0 }
 0x7c9   : > { %1223 = vmatmul.mubr.msk.f32.vlgmr.msra.gmra.mxu0 %vm97_vm2, %v717_v53 }
 0x889   : > { %v787_v54 = vpop.f32.mrf.mxu0 }
 0x88a   : > { %v788_v55 = vadd.f32 %v787_v54, %v1390_v21 }
 0x88b   : > { %v1224_v56 = vpop.f32.mrf.mxu0 }
 0x88c   : > { %v791_v57 = vmax.f32 %v788_v55, 0.0 }
 0x88e   : > { %1234 = vmatmul.mubr.msk.f32.vlgmr.msra.gmra.mxu1 %vm97_vm2, %v791_v57 }
 0x94e   : > { %v861_v58 = vpop.f32.mrf.mxu1 }
 0x94f   : > { %v862_v59 = vadd.f32 %v861_v58, %v1390_v21 }
 0x950   : > { %v1235_v60 = vpop.f32.mrf.mxu1 }
 0x951   : > { %v865_v61 = vmax.f32 %v862_v59, 0.0 }
 0x953   : > { %866 = vst.msk [vmem:[#allocation2] sm:$0xff] %vm97_vm2, %v865_v61  ;;  %v867_v62 = vsub.f32 %v865_v61, %v791_v57 }
 0x955   : > { %v868_v63 = vand.u32 2147483647, %v867_v62 }
 0x957   : > { %v869_v1 = vsel %vm97_vm2, %v868_v63, -inf }
 0x958   : > { %870 = vmax.xlane.f32.xlu0 %v869_v1 }
 0x9e1   : > { %v871_v2 = vpop.xlane.xlu0 %870 }
 0x9e2   : > { %v872_v4 = vrot.slane %v871_v2, 4 }
 0x9e4   : > { %v873_v5 = vmax.f32 %v871_v2, %v872_v4 }
 0x9e6   : > { %v874_v6 = vrot.slane %v873_v5, 2 }
 0x9e8   : > { %v875_v7 = vmax.f32 %v873_v5, %v874_v6 }
 0x9ea   : > { %v876_v8 = vrot.slane %v875_v7, 1 }
 0x9ec   : > { %v877_v9 = vmax.f32 %v875_v7, %v876_v8 }
 0x9ee   : > { %1256 = vpush %v877_v9 }
 0xa1f   : > { %s1257_s7 = spop %1256 }
 0xa20   : > { %p115_p2 = scmp.ge.f32.partialorder %s1257_s7, 3e-06 }
 0xa22   : > { %p116_p3 = pnand %p115_p2, %p114_p1 }
 0xa24   :  { %119 = sbr.rel (!%p116_p3) target bundleno = 408 (0x198), region = 47 }
 0xa29 PF:  { %1243 = vmatprep.subr.mxu1 %v1278_v0  ;;  %v884_v10 = vld [vmem:[%s1519_s2 + $0x18] sm:$0xff]  ;;  %1236 = vmatprep.subr.mxu0 %v1278_v0  ;;  %v886_v11 = vld [vmem:[%s1520_s3 + $0x8] sm:$0xff]  ;;  %v883_v12 = vld [vmem:[%s1519_s2 + $0x10] sm:$0xff]  ;;  %vm1030_vm4 = vcmask 31744  }
 0xa2a   :  { %1244 = vmatpush3.msra.mxu1 %v884_v10  ;;  %1237 = vmatpush3.msra.mxu0 %v886_v11  ;;  %v885_v13 = vld [vmem:[%s1520_s3] sm:$0xff]  ;;  %v882_v14 = vld [vmem:[%s1519_s2 + $0x8] sm:$0xff] }
 0xa2b   :  { %1245 = vmatprep.subr.mxu1 %v1278_v0  ;;  %1238 = vmatprep.subr.mxu0 %v1278_v0  ;;  %v881_v15 = vld [vmem:[%s1519_s2] sm:$0xff] }
 0xa2c   :  { %1246 = vmatpush3.msra.mxu1 %v883_v12  ;;  %1239 = vmatpush3.msra.mxu0 %v885_v13  ;;  %v880_v16 = vld [vmem:[#allocation2] sm:$0xff] }
 0xa2d   :  { %1247 = vmatprep.subr.mxu1 %v1278_v0  ;;  %1240 = vmatprep.mubr.msk.f32.mxu0 %vm1279_vm0, %v1278_v0 }
 0xa2e   :  { %1248 = vmatpush3.msra.mxu1 %v882_v14  ;;  %1241 = vmatmul.mubr.msk.f32.vlgmr.msra.gmra.mxu0 %vm23_vm1, %v1324_v3 }
 0xa2f   :  { %1249 = vmatprep.subr.mxu1 %v1278_v0  ;;  %1251 = vmatprep.mubr.msk.f32.mxu1 %vm1279_vm0, %v1278_v0 }
 0xa30   :  { %1250 = vmatpush3.msra.mxu1 %v881_v15 }
 0xa31   :  { %1252 = vmatmul.mubr.msk.f32.vlgmr.msra.gmra.mxu1 %vm97_vm2, %v880_v16 }
 0xaee   :  { %v953_v17 = vpop.f32.mrf.mxu0 }
 0xaf0   :  { %v1242_v18 = vpop.f32.mrf.mxu0 }
 0xaf1   :  { %v1026_v19 = vpop.f32.mrf.mxu1 }
 0xaf2   :  { %v1027_v20 = vadd.f32 %v1026_v19, %v953_v17 }
 0xaf3   :  { %v1253_v21 = vpop.f32.mrf.mxu1 }
 0xaf4   :  { %1031 = vst.msk [vmem:[%s1521_s5] sm:$0xff] %vm1030_vm4, %v1027_v20 }

</bundles_post_ra>
